<compile_context>
chip_gen: v6e
topology: v6e:2x2x1
jax: 0.10.0
libtpu: 0.0.40
codegen_flags: <defaults>
</compile_context>

<pallas_src>
import functools

import jax
import jax.numpy as jnp
from jax.experimental import pallas as pl
from jax.experimental.pallas import tpu as pltpu


def _round_up(x, m):
    return ((x + m - 1) // m) * m


def policy_act_kernel(x_ref, w1_ref, b1_ref, w2_ref, b2_ref, w3_ref, b3_ref,
                      actor_ref, packed_ref, *, hidden, num_actions):
    x = x_ref[...]

    # Fused layer 1: columns [0:H) = actor layer-1, [H:2H) = critic layer-1.
    h1 = jnp.tanh(jnp.dot(x, w1_ref[...], preferred_element_type=jnp.float32)
                  + b1_ref[...])

    # Fused layer 2 (block-diagonal weight): columns [0:H) = hidden_actor,
    # [H:2H) = hidden_critic.
    h2 = jnp.tanh(jnp.dot(h1, w2_ref[...], preferred_element_type=jnp.float32)
                  + b2_ref[...])
    actor_ref[...] = h2[:, :hidden]          # actor_features

    # Fused heads (block-structured weight): col 0 = critic_linear(hidden_critic),
    # cols 1..A = Categorical logits(hidden_actor).
    head = (jnp.dot(h2, w3_ref[...], preferred_element_type=jnp.float32)
            + b3_ref[...])
    value = head[:, 0:1]
    logits = head[:, 1:1 + num_actions]

    # log-softmax (max-shifted)
    m = jnp.max(logits, axis=-1, keepdims=True)
    z = logits - m
    sumexp = jnp.sum(jnp.exp(z), axis=-1, keepdims=True)
    lse = jnp.log(sumexp)
    logp = z - lse
    probs = jnp.exp(logp)

    # deterministic action = dist.mode() = argmax (first occurrence on ties)
    ids = jax.lax.broadcasted_iota(jnp.int32, logits.shape, 1)
    action = jnp.min(jnp.where(logits == m, ids, num_actions),
                     axis=-1, keepdims=True)

    # log p(argmax action): shifted logit at the argmax is exactly 0, so it is -lse.
    alp = -lse
    # per-row entropy (mean taken in the wrapper)
    ent = -jnp.sum(probs * logp, axis=-1, keepdims=True)

    # Pack the four narrow results into one lane slab -> single store.
    pad = jnp.zeros_like(value)
    packed_ref[...] = jnp.concatenate(
        [value, action.astype(jnp.float32), alp, ent, pad, pad, pad, pad],
        axis=-1)


def prepare_params(params):
    """Fuse the 12 Linear weights/biases into 3 weight + 3 bias arrays (once)."""
    H = params["wa2"].shape[1]
    A = params["wd"].shape[1]
    f32 = jnp.float32

    w1 = jnp.concatenate([params["wa1"], params["wc1"]], axis=1)          # (D, 2H)
    b1 = jnp.concatenate([params["ba1"], params["bc1"]], axis=1)          # (1, 2H)

    w2 = jnp.zeros((2 * H, 2 * H), f32)                                   # block-diag
    w2 = w2.at[:H, :H].set(params["wa2"]).at[H:, H:].set(params["wc2"])
    b2 = jnp.concatenate([params["ba2"], params["bc2"]], axis=1)          # (1, 2H)

    w3 = jnp.zeros((2 * H, 1 + A), f32)                                   # heads
    w3 = w3.at[H:, 0:1].set(params["wv"]).at[:H, 1:].set(params["wd"])
    b3 = jnp.concatenate([params["bv"], params["bd"]], axis=1)            # (1, 1+A)

    return (w1, b1, w2, b2, w3, b3), H, A


def policy_act(x, params, *, tile_b=512):
    (w1, b1, w2, b2, w3, b3), H, A = prepare_params(params)
    B, D = x.shape

    # Batch tiling: weights stay resident, x/outputs stream in TILE_B-row tiles.
    tb = min(tile_b, _round_up(B, 8))
    Bp = _round_up(B, tb)
    xp = x if Bp == B else jnp.pad(x, ((0, Bp - B), (0, 0)))
    grid = (Bp // tb,)

    def rep_spec(shape):
        return pl.BlockSpec(shape, lambda i: (0, 0))

    in_specs = [
        pl.BlockSpec((tb, D), lambda i: (i, 0)),
        rep_spec(w1.shape), rep_spec(b1.shape),
        rep_spec(w2.shape), rep_spec(b2.shape),
        rep_spec(w3.shape), rep_spec(b3.shape),
    ]
    out_shapes = (
        jax.ShapeDtypeStruct((Bp, H), jnp.float32),   # actor_features
        jax.ShapeDtypeStruct((Bp, 8), jnp.float32),   # packed: value|action|alp|ent|0..
    )
    out_specs = (
        pl.BlockSpec((tb, H), lambda i: (i, 0)),
        pl.BlockSpec((tb, 8), lambda i: (i, 0)),
    )

    kernel = functools.partial(policy_act_kernel, hidden=H, num_actions=A)
    actor, packed = pl.pallas_call(
        kernel,
        out_shape=out_shapes,
        grid=grid,
        in_specs=in_specs,
        out_specs=out_specs,
        compiler_params=pltpu.CompilerParams(
            dimension_semantics=("parallel",)),
    )(xp, w1, b1, w2, b2, w3, b3)

    actor = actor[:B]
    packed = packed[:B]
    value = packed[:, 0:1]
    action = packed[:, 1:2].astype(jnp.int32)
    action_log_probs = packed[:, 2:3]
    ent_rows = packed[:, 3:4]
    return value, actor, action, action_log_probs, ent_rows


def _reference_act(x, params):
    """Pure-JAX reference mirroring Policy.act(deterministic=True)."""
    hc = jnp.tanh(x @ params["wc1"] + params["bc1"])
    hc = jnp.tanh(hc @ params["wc2"] + params["bc2"])
    ha = jnp.tanh(x @ params["wa1"] + params["ba1"])
    ha = jnp.tanh(ha @ params["wa2"] + params["ba2"])
    value = hc @ params["wv"] + params["bv"]
    logits = ha @ params["wd"] + params["bd"]
    logp = jax.nn.log_softmax(logits, axis=-1)
    action = jnp.argmax(logits, axis=-1, keepdims=True)
    alp = jnp.take_along_axis(logp, action, axis=-1)
    ent = -jnp.sum(jnp.exp(logp) * logp, axis=-1, keepdims=True)
    return value, ha, action.astype(jnp.int32), alp, ent


if __name__ == "__main__":
    # Small shapes: batch=8, num_inputs=32, hidden=32, num_actions=8
    B, D, H, A = 8, 32, 32, 8

    key = jax.random.PRNGKey(0)
    keys = jax.random.split(key, 8)
    sqrt2 = float(jnp.sqrt(2.0))

    def orth(k, shape, gain):
        return jax.nn.initializers.orthogonal(scale=gain)(k, shape, jnp.float32)

    # Deterministic synthetic parameters mirroring the module's init scheme:
    # orthogonal(gain=sqrt(2)) for actor/critic MLP, gain=1 for critic_linear,
    # gain=0.01 for the Categorical dist head; all biases zero.  Weights stored
    # (in, out) so x @ W + b == torch's x @ W.T + b with (out, in) weights.
    params = dict(
        wa1=orth(keys[0], (D, H), sqrt2), ba1=jnp.zeros((1, H), jnp.float32),
        wa2=orth(keys[1], (H, H), sqrt2), ba2=jnp.zeros((1, H), jnp.float32),
        wc1=orth(keys[2], (D, H), sqrt2), bc1=jnp.zeros((1, H), jnp.float32),
        wc2=orth(keys[3], (H, H), sqrt2), bc2=jnp.zeros((1, H), jnp.float32),
        wv=orth(keys[4], (H, 1), 1.0),    bv=jnp.zeros((1, 1), jnp.float32),
        wd=orth(keys[5], (H, A), 0.01),   bd=jnp.zeros((1, A), jnp.float32),
    )

    x = jax.random.normal(keys[6], (B, D), jnp.float32)
    # non-recurrent: recurrent_hidden_state_size == 1, masks pass through unused
    rnn_hxs = jnp.zeros((B, 1), jnp.float32)
    masks = jnp.ones((B, 1), jnp.float32)

    value, actor_features, action, action_log_probs, ent_rows = policy_act(x, params)
    dist_entropy = jnp.mean(ent_rows)  # dist.entropy().mean()

    jax.block_until_ready((value, actor_features, action, action_log_probs,
                           dist_entropy, rnn_hxs))

    # Light correctness check against a pure-JAX reference (loose tol: MXU f32 path).
    rv, ra, _, ralp, rent = _reference_act(x, params)
    assert jnp.allclose(value, rv, atol=1e-2, rtol=1e-2)
    assert jnp.allclose(actor_features, ra, atol=1e-2, rtol=1e-2)
    assert jnp.allclose(ent_rows, rent, atol=1e-2, rtol=1e-2)

    print("KERNEL_OK")
</pallas_src>

<mosaic_0001>
module attributes {stable_mosaic.version = 11 : i64} {
  func.func @policy_act_kernel(%arg0: i32, %arg1: memref<8x32xf32, #tpu.memory_space<vmem>>, %arg2: memref<32x64xf32, #tpu.memory_space<vmem>>, %arg3: memref<1x64xf32, #tpu.memory_space<vmem>>, %arg4: memref<64x64xf32, #tpu.memory_space<vmem>>, %arg5: memref<1x64xf32, #tpu.memory_space<vmem>>, %arg6: memref<64x9xf32, #tpu.memory_space<vmem>>, %arg7: memref<1x9xf32, #tpu.memory_space<vmem>>, %arg8: memref<8x32xf32, #tpu.memory_space<vmem>>, %arg9: memref<8x8xf32, #tpu.memory_space<vmem>>) attributes {dimension_semantics = [#tpu.dimension_semantics<parallel>], iteration_bounds = array<i64: 1>, scalar_prefetch = 0 : i64, scratch_operands = 0 : i64, tpu.core_type = #tpu.core_type<tc>, window_params = [{transform_indices = @transform_0, window_bounds = array<i64: 8, 32>}, {pipeline_mode = #tpu.pipeline_mode<synchronous>, transform_indices = @transform_1, window_bounds = array<i64: 32, 64>}, {pipeline_mode = #tpu.pipeline_mode<synchronous>, transform_indices = @transform_2, window_bounds = array<i64: 1, 64>}, {pipeline_mode = #tpu.pipeline_mode<synchronous>, transform_indices = @transform_3, window_bounds = array<i64: 64, 64>}, {pipeline_mode = #tpu.pipeline_mode<synchronous>, transform_indices = @transform_4, window_bounds = array<i64: 1, 64>}, {pipeline_mode = #tpu.pipeline_mode<synchronous>, transform_indices = @transform_5, window_bounds = array<i64: 64, 9>}, {pipeline_mode = #tpu.pipeline_mode<synchronous>, transform_indices = @transform_6, window_bounds = array<i64: 1, 9>}, {transform_indices = @transform_7, window_bounds = array<i64: 8, 32>}, {transform_indices = @transform_8, window_bounds = array<i64: 8, 8>}]} {
    %c0 = arith.constant 0 : index
    %c0_0 = arith.constant 0 : index
    %0 = vector.load %arg1[%c0, %c0_0] : memref<8x32xf32, #tpu.memory_space<vmem>>, vector<8x32xf32>
    %c0_1 = arith.constant 0 : index
    %c0_2 = arith.constant 0 : index
    %1 = vector.load %arg2[%c0_1, %c0_2] : memref<32x64xf32, #tpu.memory_space<vmem>>, vector<32x64xf32>
    %cst = arith.constant dense<0.000000e+00> : vector<8x64xf32>
    %2 = tpu.matmul %0, %1, %cst {dimension_numbers = #tpu.dot_dimension_numbers<[1], [0], [0], [1], [0, 0, 1, 1], [], []>} : vector<8x32xf32>, vector<32x64xf32>, vector<8x64xf32> -> vector<8x64xf32>
    %c0_3 = arith.constant 0 : index
    %c0_4 = arith.constant 0 : index
    %3 = vector.load %arg3[%c0_3, %c0_4] : memref<1x64xf32, #tpu.memory_space<vmem>>, vector<1x64xf32>
    %4 = vector.broadcast %3 : vector<1x64xf32> to vector<8x64xf32>
    %5 = arith.addf %2, %4 : vector<8x64xf32>
    %6 = math.tanh %5 : vector<8x64xf32>
    %c0_5 = arith.constant 0 : index
    %c0_6 = arith.constant 0 : index
    %7 = vector.load %arg4[%c0_5, %c0_6] : memref<64x64xf32, #tpu.memory_space<vmem>>, vector<64x64xf32>
    %cst_7 = arith.constant dense<0.000000e+00> : vector<8x64xf32>
    %8 = tpu.matmul %6, %7, %cst_7 {dimension_numbers = #tpu.dot_dimension_numbers<[1], [0], [0], [1], [0, 0, 1, 1], [], []>} : vector<8x64xf32>, vector<64x64xf32>, vector<8x64xf32> -> vector<8x64xf32>
    %c0_8 = arith.constant 0 : index
    %c0_9 = arith.constant 0 : index
    %9 = vector.load %arg5[%c0_8, %c0_9] : memref<1x64xf32, #tpu.memory_space<vmem>>, vector<1x64xf32>
    %10 = vector.broadcast %9 : vector<1x64xf32> to vector<8x64xf32>
    %11 = arith.addf %8, %10 : vector<8x64xf32>
    %12 = math.tanh %11 : vector<8x64xf32>
    %13 = vector.extract_strided_slice %12 {offsets = [0, 0], sizes = [8, 32], strides = [1, 1]} : vector<8x64xf32> to vector<8x32xf32>
    %c0_10 = arith.constant 0 : index
    %c0_11 = arith.constant 0 : index
    %14 = vector.load %arg8[%c0_10, %c0_11] : memref<8x32xf32, #tpu.memory_space<vmem>>, vector<8x32xf32>
    tpu.vector_store %arg8[%c0_10, %c0_11], %13 {strides = array<i32>} : memref<8x32xf32, #tpu.memory_space<vmem>>, vector<8x32xf32>,
    %c0_12 = arith.constant 0 : index
    %c0_13 = arith.constant 0 : index
    %15 = vector.load %arg6[%c0_12, %c0_13] : memref<64x9xf32, #tpu.memory_space<vmem>>, vector<64x9xf32>
    %cst_14 = arith.constant dense<0.000000e+00> : vector<8x9xf32>
    %16 = tpu.matmul %12, %15, %cst_14 {dimension_numbers = #tpu.dot_dimension_numbers<[1], [0], [0], [1], [0, 0, 1, 1], [], []>} : vector<8x64xf32>, vector<64x9xf32>, vector<8x9xf32> -> vector<8x9xf32>
    %c0_15 = arith.constant 0 : index
    %c0_16 = arith.constant 0 : index
    %17 = vector.load %arg7[%c0_15, %c0_16] : memref<1x9xf32, #tpu.memory_space<vmem>>, vector<1x9xf32>
    %18 = vector.broadcast %17 : vector<1x9xf32> to vector<8x9xf32>
    %19 = arith.addf %16, %18 : vector<8x9xf32>
    %20 = vector.extract_strided_slice %19 {offsets = [0, 0], sizes = [8, 1], strides = [1, 1]} : vector<8x9xf32> to vector<8x1xf32>
    %21 = vector.extract_strided_slice %19 {offsets = [0, 1], sizes = [8, 8], strides = [1, 1]} : vector<8x9xf32> to vector<8x8xf32>
    %cst_17 = arith.constant dense<0xFF800000> : vector<8xf32>
    %22 = vector.multi_reduction <maximumf>, %21, %cst_17 [1] : vector<8x8xf32> to vector<8xf32>
    %23 = vector.shape_cast %22 : vector<8xf32> to vector<8x1xf32>
    %24 = vector.broadcast %23 : vector<8x1xf32> to vector<8x8xf32>
    %25 = arith.subf %21, %24 : vector<8x8xf32>
    %26 = math.exp %25 : vector<8x8xf32>
    %cst_18 = arith.constant dense<0.000000e+00> : vector<8xf32>
    %27 = vector.multi_reduction <add>, %26, %cst_18 [1] : vector<8x8xf32> to vector<8xf32>
    %28 = vector.shape_cast %27 : vector<8xf32> to vector<8x1xf32>
    %29 = math.log %28 : vector<8x1xf32>
    %30 = vector.broadcast %29 : vector<8x1xf32> to vector<8x8xf32>
    %31 = arith.subf %25, %30 : vector<8x8xf32>
    %32 = math.exp %31 : vector<8x8xf32>
    %33 = tpu.iota {dimensions = array<i32: 1>} : vector<8x8xi32>
    %34 = vector.broadcast %23 : vector<8x1xf32> to vector<8x8xf32>
    %35 = arith.cmpf oeq, %21, %34 : vector<8x8xf32>
    %c8_i32 = arith.constant 8 : i32
    %36 = vector.broadcast %c8_i32 : i32 to vector<8x8xi32>
    %37 = arith.select %35, %33, %36 : vector<8x8xi1>, vector<8x8xi32>
    %cst_19 = arith.constant dense<2147483647> : vector<8xi32>
    %38 = vector.multi_reduction <minsi>, %37, %cst_19 [1] : vector<8x8xi32> to vector<8xi32>
    %39 = vector.shape_cast %38 : vector<8xi32> to vector<8x1xi32>
    %cst_20 = arith.constant 0.000000e+00 : f32
    %40 = vector.broadcast %cst_20 : f32 to vector<8x1xf32>
    %41 = arith.subf %40, %29 : vector<8x1xf32>
    %42 = arith.mulf %32, %31 : vector<8x8xf32>
    %cst_21 = arith.constant dense<0.000000e+00> : vector<8xf32>
    %43 = vector.multi_reduction <add>, %42, %cst_21 [1] : vector<8x8xf32> to vector<8xf32>
    %44 = vector.shape_cast %43 : vector<8xf32> to vector<8x1xf32>
    %cst_22 = arith.constant 0.000000e+00 : f32
    %45 = vector.broadcast %cst_22 : f32 to vector<8x1xf32>
    %46 = arith.subf %45, %44 : vector<8x1xf32>
    %cst_23 = arith.constant 0.000000e+00 : f32
    %47 = vector.broadcast %cst_23 : f32 to vector<8x1xf32>
    %48 = arith.sitofp %39 : vector<8x1xi32> to vector<8x1xf32>
    %49 = tpu.concatenate %20, %48, %41, %46, %47, %47, %47, %47 in 1 : vector<8x1xf32>, vector<8x1xf32>, vector<8x1xf32>, vector<8x1xf32>, vector<8x1xf32>, vector<8x1xf32>, vector<8x1xf32>, vector<8x1xf32> -> vector<8x8xf32>
    %c0_24 = arith.constant 0 : index
    %c0_25 = arith.constant 0 : index
    %50 = vector.load %arg9[%c0_24, %c0_25] : memref<8x8xf32, #tpu.memory_space<vmem>>, vector<8x8xf32>
    tpu.vector_store %arg9[%c0_24, %c0_25], %49 {strides = array<i32>} : memref<8x8xf32, #tpu.memory_space<vmem>>, vector<8x8xf32>,
    return
  }
  func.func @transform_0(%arg0: i32) -> (i32, i32) {
    %c0_i32 = arith.constant 0 : i32
    %c0_i32_0 = arith.constant 0 : i32
    return %arg0, %c0_i32 : i32, i32
  }
  func.func @transform_1(%arg0: i32) -> (i32, i32) {
    %c0_i32 = arith.constant 0 : i32
    %c0_i32_0 = arith.constant 0 : i32
    %c0_i32_1 = arith.constant 0 : i32
    return %c0_i32, %c0_i32_0 : i32, i32
  }
  func.func @transform_2(%arg0: i32) -> (i32, i32) {
    %c0_i32 = arith.constant 0 : i32
    %c0_i32_0 = arith.constant 0 : i32
    %c0_i32_1 = arith.constant 0 : i32
    return %c0_i32, %c0_i32_0 : i32, i32
  }
  func.func @transform_3(%arg0: i32) -> (i32, i32) {
    %c0_i32 = arith.constant 0 : i32
    %c0_i32_0 = arith.constant 0 : i32
    %c0_i32_1 = arith.constant 0 : i32
    return %c0_i32, %c0_i32_0 : i32, i32
  }
  func.func @transform_4(%arg0: i32) -> (i32, i32) {
    %c0_i32 = arith.constant 0 : i32
    %c0_i32_0 = arith.constant 0 : i32
    %c0_i32_1 = arith.constant 0 : i32
    return %c0_i32, %c0_i32_0 : i32, i32
  }
  func.func @transform_5(%arg0: i32) -> (i32, i32) {
    %c0_i32 = arith.constant 0 : i32
    %c0_i32_0 = arith.constant 0 : i32
    %c0_i32_1 = arith.constant 0 : i32
    return %c0_i32, %c0_i32_0 : i32, i32
  }
  func.func @transform_6(%arg0: i32) -> (i32, i32) {
    %c0_i32 = arith.constant 0 : i32
    %c0_i32_0 = arith.constant 0 : i32
    %c0_i32_1 = arith.constant 0 : i32
    return %c0_i32, %c0_i32_0 : i32, i32
  }
  func.func @transform_7(%arg0: i32) -> (i32, i32) {
    %c0_i32 = arith.constant 0 : i32
    %c0_i32_0 = arith.constant 0 : i32
    return %arg0, %c0_i32 : i32, i32
  }
  func.func @transform_8(%arg0: i32) -> (i32, i32) {
    %c0_i32 = arith.constant 0 : i32
    %c0_i32_0 = arith.constant 0 : i32
    return %arg0, %c0_i32 : i32, i32
  }
}

</mosaic_0001>

<bundles_post_ra>
// kernel: tpu_custom_call.1
= control target key start
LH: loop header
LB: loop body
LE: loop exit
PB: predicated region body
PF: predicated region fallthrough
CT: control target
= control target key end

     0   :  { %14 = vsyncpa [#allocation3], 0  ;;  %s733_s0 = inlined_call_operand.vmem [shape: f32[8,32], index: 0, kind: input, shape index: {}]   ;;  %s734_s1 = inlined_call_operand.hbm [shape: f32[32,64], index: 1, kind: input, shape index: {}]   ;;  %s735_s2 = inlined_call_operand.vmem [shape: f32[1,64], index: 2, kind: input, shape index: {}]   ;;  %s736_s3 = inlined_call_operand.vmem [shape: f32[64,64], index: 3, kind: input, shape index: {}]   ;;  %s737_s4 = inlined_call_operand.vmem [shape: f32[1,64], index: 4, kind: input, shape index: {}]   ;;  %s738_s5 = inlined_call_operand.vmem [shape: f32[64,9], index: 5, kind: input, shape index: {}]   ;;  %s739_s6 = inlined_call_operand.vmem [shape: f32[1,9], index: 6, kind: input, shape index: {}]   ;;  %s740_s7 = inlined_call_operand.hbm [shape: f32[8,32], index: 7, kind: output, shape index: {0}]   ;;  %s741_s8 = inlined_call_operand.hbm [shape: f32[8,8], index: 8, kind: output, shape index: {1}]  }
   0x1   :  { %15 = vsyncpa [#allocation4], 0 }
   0x2   :  { %16 = vsyncpa [#allocation7], 0  ;;  %s569_s27 = smov [#allocation2]  }
   0x3   :  { %s24_s28 = sshll.u32 %s569_s27, 4  ;;  %s25_s28 = int_to_ptr.vmem [resolvable:$true] %s24_s28 }
   0x4   :  { %s511_s29 = scalar_lea.vmem %s25_s28, 512  ;;  %p516_p1 = scmp.lt.s32.totalorder %s25_s28, %s25_s28 }
   0x5   :  { %p512_p0 = scmp.ne.s32.totalorder %s25_s28, %s511_s29  ;;  %p517_p2 = scmp.lt.s32.totalorder %s511_s29, %s511_s29 }
   0x7   :  { %p518_p3 = por %p517_p2, %p516_p1 }
   0x9   :  { %p519_p4 = pnand %p518_p3, %p512_p0 }
   0xb   :  { %522 = shalt.err (!%p519_p4)
}
   0xc   :  { %s570_s30 = smov 128   ;;  %s571_s9 = smov 8  }
   0xd   :  { %30 = dma.hbm_to_vmem [thread:$0]  %s734_s1, 512, %s25_s28, [#allocation3], %s570_s30, %s570_s30, %s571_s9  }
   0xe   :  { %563 = dma.done.wait [#allocation3], 512  }
   0xf   :  { %564 = vsyncadd [#allocation3], 4294966784  ;;  %v572_v0 = vmov 0.0   ;;  %vm573_vm0 = vmmov 0   ;;  %v48_v1 = vld [vmem:[#allocation2 + $0x18] sm:$0xff]  ;;  %v47_v2 = vld [vmem:[#allocation2 + $0x10] sm:$0xff]  ;;  %v330_v43 = vlaneseq }
  0x10   :  { %435 = vmatprep.subr.mxu0 %v572_v0  ;;  %443 = vmatprep.mubr.msk.f32.mxu0 %vm573_vm0, %v572_v0  ;;  %v46_v3 = vld [vmem:[#allocation2 + $0x8] sm:$0xff]  ;;  %v45_v4 = vld [vmem:[#allocation2] sm:$0xff]  ;;  %vm56_vm1 = vcmask 261120   ;;  %v138_v6 = vld [vmem:[%s736_s3 + $0x38] sm:$0xff]  ;;  %vm146_vm2 = vcmask 523264   ;;  %vm310_vm3 = vcmask 72712  }
  0x11   :  { %446 = vmatprep.subr.mxu1 %v572_v0  ;;  %462 = vmatprep.mubr.msk.f32.mxu1 %vm573_vm0, %v572_v0  ;;  %v44_v5 = vld [vmem:[%s733_s0] sm:$0xff]  ;;  %v137_v7 = vld [vmem:[%s736_s3 + $0x30] sm:$0xff]  ;;  %v136_v8 = vld [vmem:[%s736_s3 + $0x28] sm:$0xff]  ;;  %vm321_vm4 = vcmask 64512   ;;  %v331_v44 = vand.u32 127, %v330_v43 }
  0x12   :  { %436 = vmatpush3.msra.mxu0 %v48_v1  ;;  %447 = vmatpush3.msra.mxu1 %v138_v6  ;;  %v135_v9 = vld [vmem:[%s736_s3 + $0x20] sm:$0xff]  ;;  %v134_v10 = vld [vmem:[%s736_s3 + $0x18] sm:$0xff]  ;;  %v133_v11 = vld [vmem:[%s736_s3 + $0x10] sm:$0xff] }
  0x13   :  { %437 = vmatprep.subr.mxu0 %v572_v0  ;;  %448 = vmatprep.subr.mxu1 %v572_v0  ;;  %v132_v12 = vld [vmem:[%s736_s3 + $0x8] sm:$0xff]  ;;  %v131_v13 = vld [vmem:[%s736_s3] sm:$0xff]  ;;  %v229_v19 = vld [vmem:[%s738_s5 + $0x38] sm:$0xff] }
  0x14   :  { %438 = vmatpush3.msra.mxu0 %v47_v2  ;;  %449 = vmatpush3.msra.mxu1 %v137_v7  ;;  %v406_v14 = vld [vmem:[%s735_s2] ss:$0 sm:$0xff]  ;;  %v228_v20 = vld [vmem:[%s738_s5 + $0x30] sm:$0xff]  ;;  %v227_v21 = vld [vmem:[%s738_s5 + $0x28] sm:$0xff] }
  0x15   :  { %439 = vmatprep.subr.mxu0 %v572_v0  ;;  %450 = vmatprep.subr.mxu1 %v572_v0  ;;  %v226_v22 = vld [vmem:[%s738_s5 + $0x20] sm:$0xff]  ;;  %v225_v23 = vld [vmem:[%s738_s5 + $0x18] sm:$0xff]  ;;  %v224_v24 = vld [vmem:[%s738_s5 + $0x10] sm:$0xff] }
  0x16   :  { %440 = vmatpush3.msra.mxu0 %v46_v3  ;;  %451 = vmatpush3.msra.mxu1 %v136_v8  ;;  %v223_v25 = vld [vmem:[%s738_s5 + $0x8] sm:$0xff]  ;;  %v222_v26 = vld [vmem:[%s738_s5] sm:$0xff]  ;;  %s575_s5 = smov 1  }
  0x17   :  { %441 = vmatprep.subr.mxu0 %v572_v0  ;;  %452 = vmatprep.subr.mxu1 %v572_v0  ;;  %v408_v27 = vld [vmem:[%s737_s4] ss:$0 sm:$0xff]  ;;  %s574_s4 = smov 127  }
  0x18   :  { %442 = vmatpush3.msra.mxu0 %v45_v4  ;;  %453 = vmatpush3.msra.mxu1 %v135_v9  ;;  %v410_v32 = vld [vmem:[%s739_s6] ss:$0 sm:$0xff]  ;;  %s576_s6 = smov [#allocation5]  }
  0x19   :  { %444 = vmatmul.mubr.msk.f32.vlgmr.msra.gmra.mxu0 %vm56_vm1, %v44_v5  ;;  %465 = vmatprep.subr.mxu0 %v572_v0  ;;  %s383_s24 = sshll.u32 %s576_s6, 4  ;;  %s384_s24 = int_to_ptr.vmem [resolvable:$true] %s383_s24 }
  0x1a   :  { %481 = vmatprep.mubr.msk.f32.mxu0 %vm573_vm0, %v572_v0  ;;  %454 = vmatprep.subr.mxu1 %v572_v0  ;;  %s523_s25 = scalar_lea.vmem %s384_s24, 128  ;;  %p528_p6 = scmp.lt.s32.totalorder %s384_s24, %s384_s24 }
  0x1b   :  { %455 = vmatpush3.msra.mxu1 %v134_v10  ;;  %466 = vmatpush3.msra.mxu0 %v229_v19  ;;  %p524_p5 = scmp.ne.s32.totalorder %s384_s24, %s523_s25  ;;  %p529_p7 = scmp.lt.s32.totalorder %s523_s25, %s523_s25 }
  0x1c   :  { %456 = vmatprep.subr.mxu1 %v572_v0  ;;  %467 = vmatprep.subr.mxu0 %v572_v0 }
  0x1d   :  { %457 = vmatpush3.msra.mxu1 %v133_v11  ;;  %468 = vmatpush3.msra.mxu0 %v228_v20  ;;  %p530_p8 = por %p529_p7, %p528_p6 }
  0x1e   :  { %458 = vmatprep.subr.mxu1 %v572_v0  ;;  %469 = vmatprep.subr.mxu0 %v572_v0 }
  0x1f   :  { %459 = vmatpush3.msra.mxu1 %v132_v12  ;;  %470 = vmatpush3.msra.mxu0 %v227_v21  ;;  %p531_p9 = pnand %p530_p8, %p524_p5 }
  0x20   :  { %460 = vmatprep.subr.mxu1 %v572_v0  ;;  %471 = vmatprep.subr.mxu0 %v572_v0 }
  0x21   :  { %461 = vmatpush3.msra.mxu1 %v131_v13  ;;  %472 = vmatpush3.msra.mxu0 %v226_v22 }
  0x22   :  { %473 = vmatprep.subr.mxu0 %v572_v0 }
  0x23   :  { %474 = vmatpush3.msra.mxu0 %v225_v23 }
  0x24   :  { %475 = vmatprep.subr.mxu0 %v572_v0 }
  0x25   :  { %476 = vmatpush3.msra.mxu0 %v224_v24 }
  0x26   :  { %477 = vmatprep.subr.mxu0 %v572_v0 }
  0x27   :  { %478 = vmatpush3.msra.mxu0 %v223_v25 }
  0x28   :  { %479 = vmatprep.subr.mxu0 %v572_v0 }
  0x29   :  { %480 = vmatpush3.msra.mxu0 %v222_v26 }
  0xd9   :  { %v126_v15 = vpop.f32.mrf.mxu0 }
  0xda   :  { %v127_v16 = vadd.f32 %v406_v14, %v126_v15 }
  0xdb   :  { %v445_v17 = vpop.f32.mrf.mxu0 }
  0xdc   :  { %493 = vtanh.f32 %v127_v16 }
  0xe9   :  { %v494_v18 = vpop.eup %493 }
  0xea   :  { %463 = vmatmul.mubr.msk.f32.vlgmr.msra.gmra.mxu1 %vm146_vm2, %v494_v18 }
 0x1aa   :  { %v216_v28 = vpop.f32.mrf.mxu1 }
 0x1ab   :  { %v217_v29 = vadd.f32 %v408_v27, %v216_v28 }
 0x1ac   :  { %v464_v30 = vpop.f32.mrf.mxu1 }
 0x1ad   :  { %495 = vtanh.f32 %v217_v29 }
 0x1ba   :  { %v496_v31 = vpop.eup %495 }
 0x1bb   :  { %221 = vst.msk [vmem:[#allocation5] sm:$0xff] %vm56_vm1, %v496_v31  ;;  %482 = vmatmul.mubr.msk.f32.vlgmr.msra.gmra.mxu0 %vm146_vm2, %v496_v31 }
 0x27b   :  { %v306_v33 = vpop.f32.mrf.mxu0 }
 0x27c   :  { %v716_v34 = vadd.f32 %v410_v32, %v306_v33 }
 0x27d   :  { %v483_v35 = vpop.f32.mrf.mxu0 }
 0x27e   :  { %v311_v36 = vsel %vm310_vm3, %v716_v34, -inf }
 0x27f   :  { %312 = vmax.xlane.f32.xlu0 %v311_v36 }
 0x308   :  { %v313_v37 = vpop.xlane.xlu0 %312 }
 0x309   :  { %v314_v38 = vsub.f32 %v716_v34, %v313_v37  ;;  %vm332_vm5 = vcmp.eq.f32.partialorder %v716_v34, %v313_v37 }
 0x30b   :  { %v315_v39 = vmul.f32 1.442695, %v314_v38 }
 0x30d   :  { %497 = vpow2.f32 %v315_v39 }
 0x31a   :  { %v498_v40 = vpop.eup %497 }
 0x31b   :  { %318 = vrot.lane.b32.xlu0 %v498_v40, %s574_s4 }
 0x38d   :  { %v319_v41 = vpop.permute.xlu0 %318 }
 0x38e   :  { %v322_v42 = vsel %vm321_vm4, %v319_v41, 0.0 }
 0x38f   :  { %323 = vadd.xlane.f32.xlu1 %v322_v42 }
 0x3a0   :  { %333 = vrot.lane.b32.xlu1 %v331_v44, %s575_s5 }
 0x418   :  { %v324_v45 = vpop.xlane.xlu1 %323 }
 0x419   :  { %499 = vlog2.f32 %v324_v45 }
 0x41c   :  { %v334_v46 = vpop.permute.xlu1 %333 }
 0x41d   :  { %v335_v47 = vsel %vm332_vm5, %v334_v46, 8 }
 0x41e   :  { %v336_v48 = vsel %vm310_vm3, %v335_v47, 2147483647 }
 0x41f   :  { %v338_v49 = vshra.s32 %v336_v48, 16  ;;  %v337_v57 = vand.u32 65535, %v336_v48 }
 0x421   :  { %v340_v50 = vcvt.s32.f32 %v338_v49  ;;  %v339_v59 = vcvt.s32.f32 %v337_v57 }
 0x423   :  { %341 = vmin.xlane.f32.xlu1 %v340_v50 }
 0x426   :  { %v500_v51 = vpop.eup %499 }
 0x427   :  { %v326_v52 = vmul.f32 0.6931472, %v500_v51 }
 0x429   :  { %v327_v53 = vsub.f32 %v314_v38, %v326_v52 }
 0x42b   :  { %v328_v54 = vmul.f32 1.442695, %v327_v53 }
 0x42d   :  { %501 = vpow2.f32 %v328_v54 }
 0x43a   :  { %v502_v55 = vpop.eup %501 }
 0x43b   :  { %v352_v56 = vmul.f32 %v502_v55, %v327_v53 }
 0x43d   :  { %354 = vrot.lane.b32.xlu0 %v352_v56, %s574_s4 }
 0x4ac   :  { %v342_v58 = vpop.xlane.xlu1 %341 }
 0x4ad   :  { %vm343_vm6 = vcmp.eq.f32.partialorder %v340_v50, %v342_v58 }
 0x4ae   :  { %v344_v60 = vsel %vm343_vm6, %v339_v59, inf }
 0x4af   :  { %v355_v61 = vpop.permute.xlu0 %354  ;;  %345 = vmin.xlane.f32.xlu0 %v344_v60 }
 0x4b0   :  { %v357_v62 = vsel %vm321_vm4, %v355_v61, 0.0 }
 0x4b1   :  { %358 = vadd.xlane.f32.xlu1 %v357_v62 }
 0x4b2   :  { %534 = shalt.err (!%p531_p9)
}
 0x4b3   :  { %386 = dma.vmem_to_hbm [thread:$0]  %s384_s24, 128, %s740_s7, [#allocation4]   ;;  %v348_v63 = vcvt.f32.s32 %v342_v58  ;;  %vm362_vm7 = vcmask 7168   ;;  %vm364_vm8 = vcmask 15360   ;;  %v351_v6 = vsub.f32 0.0, %v326_v52 }
 0x4b4   :  { %vm366_vm9 = vcmask 23552   ;;  %vm368_vm10 = vcmask 31744   ;;  %vm370_vm11 = vcmask 39936   ;;  %vm372_vm12 = vcmask 48128   ;;  %s577_s7 = smov [#allocation6]  }
 0x4b5   :  { %v349_v1 = vshll.u32 %v348_v63, 16  ;;  %s393_s28 = sshll.u32 %s577_s7, 4  ;;  %vm374_vm13 = vcmask 56320   ;;  %s394_s28 = int_to_ptr.vmem [resolvable:$true] %s393_s28 }
 0x4b6   :  { %s543_s29 = scalar_lea.vmem %s394_s28, 128  ;;  %p548_p11 = scmp.lt.s32.totalorder %s394_s28, %s394_s28 }
 0x4b7   :  { %p544_p10 = scmp.ne.s32.totalorder %s394_s28, %s543_s29  ;;  %p549_p12 = scmp.lt.s32.totalorder %s543_s29, %s543_s29 }
 0x4b9   :  { %p550_p13 = por %p549_p12, %p548_p11 }
 0x4bb   :  { %p551_p0 = pnand %p550_p13, %p544_p10 }
 0x538   :  { %v346_v0 = vpop.xlane.xlu0 %345 }
 0x539   :  { %v347_v2 = vcvt.f32.s32 %v346_v0 }
 0x53a   :  { %v359_v4 = vpop.xlane.xlu1 %358 }
 0x53b   :  { %v350_v3 = vadd.s32 %v349_v1, %v347_v2  ;;  %v360_v8 = vsub.f32 0.0, %v359_v4 }
 0x53d   :  { %v361_v5 = vcvt.s32.f32 %v350_v3 }
 0x53f   :  { %v363_v7 = vsel %vm362_vm7, %v716_v34, %v361_v5 }
 0x540   :  { %v365_v9 = vsel %vm364_vm8, %v363_v7, %v351_v6 }
 0x541   :  { %v367_v10 = vsel %vm366_vm9, %v365_v9, %v360_v8 }
 0x542   :  { %v369_v11 = vsel %vm368_vm10, %v367_v10, 0.0 }
 0x543   :  { %v371_v12 = vsel %vm370_vm11, %v369_v11, 0.0 }
 0x544   :  { %v373_v13 = vsel %vm372_vm12, %v371_v12, 0.0 }
 0x545   :  { %v375_v14 = vsel %vm374_vm13, %v373_v13, 0.0 }
 0x546   :  { %376 = vst.msk [vmem:[#allocation6] sm:$0xff] %vm321_vm4, %v375_v14 }
 0x547   :  { %554 = shalt.err (!%p551_p0)
}
 0x548   :  { %396 = dma.vmem_to_hbm [thread:$0]  %s394_s28, 128, %s741_s8, [#allocation7]  }
 0x549   :  { %565 = dma.done.wait [#allocation4], 128  }
 0x54a   :  { %566 = vsyncadd [#allocation4], 4294967168 }
 0x54b   :  { %567 = dma.done.wait [#allocation7], 128  }
 0x54c   :  { %568 = vsyncadd [#allocation7], 4294967168 }
 0x54d   :  { %403 = vsyncpa [#allocation3], 1 }
 0x54e   :  { %404 = vsyncpa [#allocation4], 1 }
 0x54f   :  { %405 = vsyncpa [#allocation7], 1 }

</bundles_post_ra>
